<compile_context>
chip_gen: v7x
topology: tpu7x:2x2x1
jax: 0.10.0
libtpu: 0.0.40
codegen_flags: <defaults>
</compile_context>

<pallas_src>
import functools

import jax
import jax.numpy as jnp
import numpy as np
from jax.experimental import pallas as pl
from jax.experimental.pallas import tpu as pltpu


# --------------------------------------------------------------------------------------
# Fused Pallas kernel: all rounds of GMS message passing in one call
# --------------------------------------------------------------------------------------
def _vmem_spec():
    return pl.BlockSpec(memory_space=pltpu.MemorySpace.VMEM)


def _round_up(x, m):
    return ((x + m - 1) // m) * m


def _gms_kernel(lh_ref, ch_ref, adj_lc_ref, adj_cl_ref,
                mlp_w_ref, mlp_b_ref, w_ih_ref, w_hh_ref, b_lstm_ref,
                lh_out_ref, ch_out_ref, *, num_round, num_layers, vp):
    """Fused GMS forward.

    lh_ref:   [2*vp, D]  literal hidden init (pos rows 0..vp, neg rows vp..2vp, zero-padded)
    ch_ref:   [cp, D]    clause hidden init (zero-padded rows)
    adj_lc:   [cp, 2*vp] literal -> clause incidence ( = [pos_adj ; neg_adj]^T, zero-padded)
    adj_cl:   [vp, 2*cp] clause  -> literal incidence ( = [pos_adj | neg_adj], zero-padded)
    mlp_w:    [4, L, D, D]   MLP weights: 0=pos_l, 1=neg_l, 2=pos_c, 3=neg_c
    mlp_b:    [4, L, 1, D]
    w_ih/w_hh:[2, D, 4D]     packed LSTM weights (gate order i,f,g,o): 0=l_update, 1=c_update
    b_lstm:   [2, 1, 4D]     b_ih + b_hh folded
    """
    d = lh_ref.shape[-1]

    def mlp(x, idx):
        h = x
        for layer in range(num_layers):
            h = jnp.dot(h, mlp_w_ref[idx, layer],
                        preferred_element_type=jnp.float32) + mlp_b_ref[idx, layer]
            if layer < num_layers - 1:
                h = jnp.maximum(h, 0.0)
        return h

    def lstm(x, h, c, idx):
        # Two lane-dense [., 4D] matmuls instead of 8 narrow per-gate matmuls.
        gates = (jnp.dot(x, w_ih_ref[idx], preferred_element_type=jnp.float32)
                 + jnp.dot(h, w_hh_ref[idx], preferred_element_type=jnp.float32)
                 + b_lstm_ref[idx])
        i = jax.nn.sigmoid(gates[:, 0 * d:1 * d])
        f = jax.nn.sigmoid(gates[:, 1 * d:2 * d])
        g = jnp.tanh(gates[:, 2 * d:3 * d])
        o = jax.nn.sigmoid(gates[:, 3 * d:4 * d])
        c_new = f * c + i * g
        return o * jnp.tanh(c_new), c_new

    adj_lc = adj_lc_ref[...]   # loop-invariant, load once
    adj_cl = adj_cl_ref[...]

    def body(_, carry):
        l_h, l_c, c_h, c_c = carry

        # literal -> clause messages (pos/neg MLPs on the two literal halves, one matmul)
        l_msg = jnp.concatenate([mlp(l_h[:vp], 0), mlp(l_h[vp:], 1)], axis=0)
        l2c_msg = jnp.dot(adj_lc, l_msg, preferred_element_type=jnp.float32)

        # clause -> literal messages (both MLPs on c_h, one merged aggregation matmul)
        c_msg = jnp.concatenate([mlp(c_h, 2), mlp(c_h, 3)], axis=0)
        c2l_sum = jnp.dot(adj_cl, c_msg, preferred_element_type=jnp.float32)
        # Identity: c2l_msg + flip_c2l_msg == tile(pos_c2l + neg_c2l, 2 rows).
        l_in = jnp.concatenate([c2l_sum, c2l_sum], axis=0)

        l_h, l_c = lstm(l_in, l_h, l_c, 0)
        c_h, c_c = lstm(l2c_msg, c_h, c_c, 1)
        return l_h, l_c, c_h, c_c

    l_h0 = lh_ref[...]
    c_h0 = ch_ref[...]
    l_h, _, c_h, _ = jax.lax.fori_loop(
        0, num_round, body,
        (l_h0, jnp.zeros_like(l_h0), c_h0, jnp.zeros_like(c_h0)))

    lh_out_ref[...] = l_h
    ch_out_ref[...] = c_h


def _pack_lstm(wih, whh, b):
    """[4, D, D] per-gate weights (i,f,g,o) -> packed [D, 4D]; b: [4,1,D] -> [1,4D]."""
    d = wih.shape[-1]
    w_ih = wih.transpose(1, 0, 2).reshape(d, 4 * d)
    w_hh = whh.transpose(1, 0, 2).reshape(d, 4 * d)
    bb = b.transpose(1, 0, 2).reshape(1, 4 * d)
    return w_ih, w_hh, bb


def gms_forward(l_pos_emb, l_neg_emb, c_emb, pos_adj, neg_adj, params, num_round):
    num_vars, emb = l_pos_emb.shape
    num_clauses = c_emb.shape[0]
    vp = _round_up(num_vars, 8)       # fp32 sublane alignment
    cp = _round_up(num_clauses, 8)

    def pad_rows(x, n):
        return jnp.pad(x, ((0, n - x.shape[0]), (0, 0)))

    # LSTM hidden init from embeddings, cell state zero (matches the module).
    l_h0 = jnp.concatenate([pad_rows(l_pos_emb, vp), pad_rows(l_neg_emb, vp)], axis=0)
    c_h0 = pad_rows(c_emb, cp)

    # Loop-invariant concatenated adjacencies, built once (padded rows/cols are zero).
    pos_adj_p = jnp.pad(pos_adj, ((0, vp - num_vars), (0, cp - num_clauses)))
    neg_adj_p = jnp.pad(neg_adj, ((0, vp - num_vars), (0, cp - num_clauses)))
    adj_lc = jnp.concatenate([pos_adj_p, neg_adj_p], axis=0).T   # [cp, 2*vp]
    adj_cl = jnp.concatenate([pos_adj_p, neg_adj_p], axis=1)     # [vp, 2*cp]

    # Stack the four message MLPs: 0=pos_l, 1=neg_l, 2=pos_c, 3=neg_c.
    mlp_w = jnp.stack([params["pos_l_msg_mlp"][0], params["neg_l_msg_mlp"][0],
                       params["pos_c_msg_mlp"][0], params["neg_c_msg_mlp"][0]])
    mlp_b = jnp.stack([params["pos_l_msg_mlp"][1], params["neg_l_msg_mlp"][1],
                       params["pos_c_msg_mlp"][1], params["neg_c_msg_mlp"][1]])

    # Pack LSTM gate weights lane-dense: 0=l_update, 1=c_update.
    wih_l, whh_l, b_l = _pack_lstm(*params["l_update"])
    wih_c, whh_c, b_c = _pack_lstm(*params["c_update"])
    w_ih = jnp.stack([wih_l, wih_c])
    w_hh = jnp.stack([whh_l, whh_c])
    b_lstm = jnp.stack([b_l, b_c])

    num_layers = int(mlp_w.shape[1])
    kernel = functools.partial(_gms_kernel, num_round=num_round,
                               num_layers=num_layers, vp=vp)

    l_h, c_h = pl.pallas_call(
        kernel,
        out_shape=(jax.ShapeDtypeStruct((2 * vp, emb), jnp.float32),
                   jax.ShapeDtypeStruct((cp, emb), jnp.float32)),
        in_specs=[_vmem_spec()] * 9,
        out_specs=(_vmem_spec(), _vmem_spec()),
    )(l_h0, c_h0, adj_lc, adj_cl, mlp_w, mlp_b, w_ih, w_hh, b_lstm)

    return l_h[:num_vars], l_h[vp:vp + num_vars], c_h[:num_clauses]


# --------------------------------------------------------------------------------------
# Pure-JAX reference (mirrors the PyTorch module exactly, for correctness check)
# --------------------------------------------------------------------------------------
def _mlp_ref(x, w, b):
    h = x
    for layer in range(w.shape[0]):
        h = h @ w[layer] + b[layer, 0]
        if layer < w.shape[0] - 1:
            h = jnp.maximum(h, 0.0)
    return h


def _lstm_ref(x, h, c, wih, whh, b):
    def gate(k):
        return x @ wih[k] + h @ whh[k] + b[k, 0]

    i = jax.nn.sigmoid(gate(0))
    f = jax.nn.sigmoid(gate(1))
    g = jnp.tanh(gate(2))
    o = jax.nn.sigmoid(gate(3))
    c_new = f * c + i * g
    return o * jnp.tanh(c_new), c_new


def gms_forward_ref(l_pos_emb, l_neg_emb, c_emb, pos_adj, neg_adj, params, num_round):
    num_vars = l_pos_emb.shape[0]
    l_h = jnp.concatenate([l_pos_emb, l_neg_emb], axis=0)
    l_c = jnp.zeros_like(l_h)
    c_h = c_emb
    c_c = jnp.zeros_like(c_h)
    for _ in range(num_round):
        pos_l_msg = _mlp_ref(l_h[:num_vars], *params["pos_l_msg_mlp"])
        neg_l_msg = _mlp_ref(l_h[num_vars:], *params["neg_l_msg_mlp"])
        l2c_msg = pos_adj.T @ pos_l_msg + neg_adj.T @ neg_l_msg
        pos_c_msg = _mlp_ref(c_h, *params["pos_c_msg_mlp"])
        neg_c_msg = _mlp_ref(c_h, *params["neg_c_msg_mlp"])
        pos_c2l = pos_adj @ pos_c_msg
        neg_c2l = neg_adj @ neg_c_msg
        c2l = jnp.concatenate([pos_c2l, neg_c2l], axis=0)
        flip = jnp.concatenate([neg_c2l, pos_c2l], axis=0)
        l_h, l_c = _lstm_ref(c2l + flip, l_h, l_c, *params["l_update"])
        c_h, c_c = _lstm_ref(l2c_msg, c_h, c_c, *params["c_update"])
    return l_h[:num_vars], l_h[num_vars:], c_h


# --------------------------------------------------------------------------------------
# Deterministic parameter / input construction
# --------------------------------------------------------------------------------------
def _init_mlp(key, emb, num_fc):
    kw, kb = jax.random.split(key)
    w = jax.random.normal(kw, (num_fc, emb, emb), jnp.float32) * 0.2
    b = jax.random.normal(kb, (num_fc, 1, emb), jnp.float32) * 0.05
    return (w, b)


def _init_lstm(key, emb):
    k1, k2, k3 = jax.random.split(key, 3)
    wih = jax.random.normal(k1, (4, emb, emb), jnp.float32) * 0.2
    whh = jax.random.normal(k2, (4, emb, emb), jnp.float32) * 0.2
    b = jax.random.normal(k3, (4, 1, emb), jnp.float32) * 0.05  # b_ih + b_hh folded
    return (wih, whh, b)


if __name__ == "__main__":
    emb_size = 32
    num_fc = 3
    num_round = 2
    num_vars = 8       # pos_l nodes == neg_l nodes
    num_clauses = 10

    key = jax.random.PRNGKey(0)
    keys = jax.random.split(key, 12)

    params = {
        "pos_l_msg_mlp": _init_mlp(keys[0], emb_size, num_fc),
        "neg_l_msg_mlp": _init_mlp(keys[1], emb_size, num_fc),
        "pos_c_msg_mlp": _init_mlp(keys[2], emb_size, num_fc),
        "neg_c_msg_mlp": _init_mlp(keys[3], emb_size, num_fc),
        "l_update": _init_lstm(keys[4], emb_size),
        "c_update": _init_lstm(keys[5], emb_size),
    }

    l_pos_emb = jax.random.normal(keys[6], (num_vars, emb_size), jnp.float32)
    l_neg_emb = jax.random.normal(keys[7], (num_vars, emb_size), jnp.float32)
    c_emb = jax.random.normal(keys[8], (num_clauses, emb_size), jnp.float32)
    pos_adj = (jax.random.uniform(keys[9], (num_vars, num_clauses)) < 0.4).astype(jnp.float32)
    neg_adj = (jax.random.uniform(keys[10], (num_vars, num_clauses)) < 0.4).astype(jnp.float32)

    gms_jit = jax.jit(gms_forward, static_argnums=(6,))
    out_pos, out_neg, out_c = gms_jit(
        l_pos_emb, l_neg_emb, c_emb, pos_adj, neg_adj, params, num_round
    )
    jax.block_until_ready((out_pos, out_neg, out_c))

    ref_pos, ref_neg, ref_c = gms_forward_ref(
        l_pos_emb, l_neg_emb, c_emb, pos_adj, neg_adj, params, num_round
    )
    np.testing.assert_allclose(np.asarray(out_pos), np.asarray(ref_pos), rtol=1e-4, atol=1e-4)
    np.testing.assert_allclose(np.asarray(out_neg), np.asarray(ref_neg), rtol=1e-4, atol=1e-4)
    np.testing.assert_allclose(np.asarray(out_c), np.asarray(ref_c), rtol=1e-4, atol=1e-4)

    assert out_pos.shape == (num_vars, emb_size)
    assert out_neg.shape == (num_vars, emb_size)
    assert out_c.shape == (num_clauses, emb_size)

    print("KERNEL_OK")
</pallas_src>

<mosaic_0001>
module attributes {stable_mosaic.version = 11 : i64} {
  func.func @_gms_kernel(%arg0: memref<16x32xf32, #tpu.memory_space<vmem>>, %arg1: memref<16x32xf32, #tpu.memory_space<vmem>>, %arg2: memref<16x16xf32, #tpu.memory_space<vmem>>, %arg3: memref<8x32xf32, #tpu.memory_space<vmem>>, %arg4: memref<4x3x32x32xf32, #tpu.memory_space<vmem>>, %arg5: memref<4x3x1x32xf32, #tpu.memory_space<vmem>>, %arg6: memref<2x32x128xf32, #tpu.memory_space<vmem>>, %arg7: memref<2x32x128xf32, #tpu.memory_space<vmem>>, %arg8: memref<2x1x128xf32, #tpu.memory_space<vmem>>, %arg9: memref<16x32xf32, #tpu.memory_space<vmem>>, %arg10: memref<16x32xf32, #tpu.memory_space<vmem>>) attributes {dimension_semantics = [], scalar_prefetch = 0 : i64, scratch_operands = 0 : i64, tpu.core_type = #tpu.core_type<tc>} {
    %c0 = arith.constant 0 : index
    %c0_0 = arith.constant 0 : index
    %0 = vector.load %arg2[%c0, %c0_0] : memref<16x16xf32, #tpu.memory_space<vmem>>, vector<16x16xf32>
    %c0_1 = arith.constant 0 : index
    %c0_2 = arith.constant 0 : index
    %1 = vector.load %arg3[%c0_1, %c0_2] : memref<8x32xf32, #tpu.memory_space<vmem>>, vector<8x32xf32>
    %c0_3 = arith.constant 0 : index
    %c0_4 = arith.constant 0 : index
    %2 = vector.load %arg0[%c0_3, %c0_4] : memref<16x32xf32, #tpu.memory_space<vmem>>, vector<16x32xf32>
    %c0_5 = arith.constant 0 : index
    %c0_6 = arith.constant 0 : index
    %3 = vector.load %arg1[%c0_5, %c0_6] : memref<16x32xf32, #tpu.memory_space<vmem>>, vector<16x32xf32>
    %cst = arith.constant 0.000000e+00 : f32
    %4 = vector.broadcast %cst : f32 to vector<16x32xf32>
    %cst_7 = arith.constant 0.000000e+00 : f32
    %5 = vector.broadcast %cst_7 : f32 to vector<16x32xf32>
    %c0_i32 = arith.constant 0 : i32
    %c2_i32 = arith.constant 2 : i32
    %6 = arith.addi %c0_i32, %c2_i32 : i32
    %c1_i32 = arith.constant 1 : i32
    %7:4 = scf.for %arg11 = %c0_i32 to %6 step %c1_i32 iter_args(%arg12 = %2, %arg13 = %4, %arg14 = %3, %arg15 = %5) -> (vector<16x32xf32>, vector<16x32xf32>, vector<16x32xf32>, vector<16x32xf32>)  : i32 {
      %10 = vector.extract_strided_slice %arg12 {offsets = [0, 0], sizes = [8, 32], strides = [1, 1]} : vector<16x32xf32> to vector<8x32xf32>
      %c0_12 = arith.constant 0 : index
      %c0_13 = arith.constant 0 : index
      %c0_14 = arith.constant 0 : index
      %c0_15 = arith.constant 0 : index
      %11 = vector.load %arg4[%c0_12, %c0_13, %c0_14, %c0_15] : memref<4x3x32x32xf32, #tpu.memory_space<vmem>>, vector<1x1x32x32xf32>
      %12 = vector.shape_cast %11 : vector<1x1x32x32xf32> to vector<32x32xf32>
      %cst_16 = arith.constant dense<0.000000e+00> : vector<8x32xf32>
      %13 = tpu.matmul %10, %12, %cst_16 {dimension_numbers = #tpu.dot_dimension_numbers<[1], [0], [0], [1], [0, 0, 1, 1], [], []>} : vector<8x32xf32>, vector<32x32xf32>, vector<8x32xf32> -> vector<8x32xf32>
      %c0_17 = arith.constant 0 : index
      %c0_18 = arith.constant 0 : index
      %c0_19 = arith.constant 0 : index
      %c0_20 = arith.constant 0 : index
      %14 = vector.load %arg5[%c0_17, %c0_18, %c0_19, %c0_20] : memref<4x3x1x32xf32, #tpu.memory_space<vmem>>, vector<1x1x1x32xf32>
      %15 = vector.shape_cast %14 : vector<1x1x1x32xf32> to vector<1x32xf32>
      %16 = vector.broadcast %15 : vector<1x32xf32> to vector<8x32xf32>
      %17 = arith.addf %13, %16 : vector<8x32xf32>
      %cst_21 = arith.constant 0.000000e+00 : f32
      %18 = vector.broadcast %cst_21 : f32 to vector<8x32xf32>
      %19 = arith.maximumf %17, %18 : vector<8x32xf32>
      %c0_22 = arith.constant 0 : index
      %c1 = arith.constant 1 : index
      %c0_23 = arith.constant 0 : index
      %c0_24 = arith.constant 0 : index
      %20 = vector.load %arg4[%c0_22, %c1, %c0_23, %c0_24] : memref<4x3x32x32xf32, #tpu.memory_space<vmem>>, vector<1x1x32x32xf32>
      %21 = vector.shape_cast %20 : vector<1x1x32x32xf32> to vector<32x32xf32>
      %cst_25 = arith.constant dense<0.000000e+00> : vector<8x32xf32>
      %22 = tpu.matmul %19, %21, %cst_25 {dimension_numbers = #tpu.dot_dimension_numbers<[1], [0], [0], [1], [0, 0, 1, 1], [], []>} : vector<8x32xf32>, vector<32x32xf32>, vector<8x32xf32> -> vector<8x32xf32>
      %c0_26 = arith.constant 0 : index
      %c1_27 = arith.constant 1 : index
      %c0_28 = arith.constant 0 : index
      %c0_29 = arith.constant 0 : index
      %23 = vector.load %arg5[%c0_26, %c1_27, %c0_28, %c0_29] : memref<4x3x1x32xf32, #tpu.memory_space<vmem>>, vector<1x1x1x32xf32>
      %24 = vector.shape_cast %23 : vector<1x1x1x32xf32> to vector<1x32xf32>
      %25 = vector.broadcast %24 : vector<1x32xf32> to vector<8x32xf32>
      %26 = arith.addf %22, %25 : vector<8x32xf32>
      %cst_30 = arith.constant 0.000000e+00 : f32
      %27 = vector.broadcast %cst_30 : f32 to vector<8x32xf32>
      %28 = arith.maximumf %26, %27 : vector<8x32xf32>
      %c0_31 = arith.constant 0 : index
      %c2 = arith.constant 2 : index
      %c0_32 = arith.constant 0 : index
      %c0_33 = arith.constant 0 : index
      %29 = vector.load %arg4[%c0_31, %c2, %c0_32, %c0_33] : memref<4x3x32x32xf32, #tpu.memory_space<vmem>>, vector<1x1x32x32xf32>
      %30 = vector.shape_cast %29 : vector<1x1x32x32xf32> to vector<32x32xf32>
      %cst_34 = arith.constant dense<0.000000e+00> : vector<8x32xf32>
      %31 = tpu.matmul %28, %30, %cst_34 {dimension_numbers = #tpu.dot_dimension_numbers<[1], [0], [0], [1], [0, 0, 1, 1], [], []>} : vector<8x32xf32>, vector<32x32xf32>, vector<8x32xf32> -> vector<8x32xf32>
      %c0_35 = arith.constant 0 : index
      %c2_36 = arith.constant 2 : index
      %c0_37 = arith.constant 0 : index
      %c0_38 = arith.constant 0 : index
      %32 = vector.load %arg5[%c0_35, %c2_36, %c0_37, %c0_38] : memref<4x3x1x32xf32, #tpu.memory_space<vmem>>, vector<1x1x1x32xf32>
      %33 = vector.shape_cast %32 : vector<1x1x1x32xf32> to vector<1x32xf32>
      %34 = vector.broadcast %33 : vector<1x32xf32> to vector<8x32xf32>
      %35 = arith.addf %31, %34 : vector<8x32xf32>
      %36 = vector.extract_strided_slice %arg12 {offsets = [8, 0], sizes = [8, 32], strides = [1, 1]} : vector<16x32xf32> to vector<8x32xf32>
      %c1_39 = arith.constant 1 : index
      %c0_40 = arith.constant 0 : index
      %c0_41 = arith.constant 0 : index
      %c0_42 = arith.constant 0 : index
      %37 = vector.load %arg4[%c1_39, %c0_40, %c0_41, %c0_42] : memref<4x3x32x32xf32, #tpu.memory_space<vmem>>, vector<1x1x32x32xf32>
      %38 = vector.shape_cast %37 : vector<1x1x32x32xf32> to vector<32x32xf32>
      %cst_43 = arith.constant dense<0.000000e+00> : vector<8x32xf32>
      %39 = tpu.matmul %36, %38, %cst_43 {dimension_numbers = #tpu.dot_dimension_numbers<[1], [0], [0], [1], [0, 0, 1, 1], [], []>} : vector<8x32xf32>, vector<32x32xf32>, vector<8x32xf32> -> vector<8x32xf32>
      %c1_44 = arith.constant 1 : index
      %c0_45 = arith.constant 0 : index
      %c0_46 = arith.constant 0 : index
      %c0_47 = arith.constant 0 : index
      %40 = vector.load %arg5[%c1_44, %c0_45, %c0_46, %c0_47] : memref<4x3x1x32xf32, #tpu.memory_space<vmem>>, vector<1x1x1x32xf32>
      %41 = vector.shape_cast %40 : vector<1x1x1x32xf32> to vector<1x32xf32>
      %42 = vector.broadcast %41 : vector<1x32xf32> to vector<8x32xf32>
      %43 = arith.addf %39, %42 : vector<8x32xf32>
      %cst_48 = arith.constant 0.000000e+00 : f32
      %44 = vector.broadcast %cst_48 : f32 to vector<8x32xf32>
      %45 = arith.maximumf %43, %44 : vector<8x32xf32>
      %c1_49 = arith.constant 1 : index
      %c1_50 = arith.constant 1 : index
      %c0_51 = arith.constant 0 : index
      %c0_52 = arith.constant 0 : index
      %46 = vector.load %arg4[%c1_49, %c1_50, %c0_51, %c0_52] : memref<4x3x32x32xf32, #tpu.memory_space<vmem>>, vector<1x1x32x32xf32>
      %47 = vector.shape_cast %46 : vector<1x1x32x32xf32> to vector<32x32xf32>
      %cst_53 = arith.constant dense<0.000000e+00> : vector<8x32xf32>
      %48 = tpu.matmul %45, %47, %cst_53 {dimension_numbers = #tpu.dot_dimension_numbers<[1], [0], [0], [1], [0, 0, 1, 1], [], []>} : vector<8x32xf32>, vector<32x32xf32>, vector<8x32xf32> -> vector<8x32xf32>
      %c1_54 = arith.constant 1 : index
      %c1_55 = arith.constant 1 : index
      %c0_56 = arith.constant 0 : index
      %c0_57 = arith.constant 0 : index
      %49 = vector.load %arg5[%c1_54, %c1_55, %c0_56, %c0_57] : memref<4x3x1x32xf32, #tpu.memory_space<vmem>>, vector<1x1x1x32xf32>
      %50 = vector.shape_cast %49 : vector<1x1x1x32xf32> to vector<1x32xf32>
      %51 = vector.broadcast %50 : vector<1x32xf32> to vector<8x32xf32>
      %52 = arith.addf %48, %51 : vector<8x32xf32>
      %cst_58 = arith.constant 0.000000e+00 : f32
      %53 = vector.broadcast %cst_58 : f32 to vector<8x32xf32>
      %54 = arith.maximumf %52, %53 : vector<8x32xf32>
      %c1_59 = arith.constant 1 : index
      %c2_60 = arith.constant 2 : index
      %c0_61 = arith.constant 0 : index
      %c0_62 = arith.constant 0 : index
      %55 = vector.load %arg4[%c1_59, %c2_60, %c0_61, %c0_62] : memref<4x3x32x32xf32, #tpu.memory_space<vmem>>, vector<1x1x32x32xf32>
      %56 = vector.shape_cast %55 : vector<1x1x32x32xf32> to vector<32x32xf32>
      %cst_63 = arith.constant dense<0.000000e+00> : vector<8x32xf32>
      %57 = tpu.matmul %54, %56, %cst_63 {dimension_numbers = #tpu.dot_dimension_numbers<[1], [0], [0], [1], [0, 0, 1, 1], [], []>} : vector<8x32xf32>, vector<32x32xf32>, vector<8x32xf32> -> vector<8x32xf32>
      %c1_64 = arith.constant 1 : index
      %c2_65 = arith.constant 2 : index
      %c0_66 = arith.constant 0 : index
      %c0_67 = arith.constant 0 : index
      %58 = vector.load %arg5[%c1_64, %c2_65, %c0_66, %c0_67] : memref<4x3x1x32xf32, #tpu.memory_space<vmem>>, vector<1x1x1x32xf32>
      %59 = vector.shape_cast %58 : vector<1x1x1x32xf32> to vector<1x32xf32>
      %60 = vector.broadcast %59 : vector<1x32xf32> to vector<8x32xf32>
      %61 = arith.addf %57, %60 : vector<8x32xf32>
      %62 = tpu.concatenate %35, %61 in 0 : vector<8x32xf32>, vector<8x32xf32> -> vector<16x32xf32>
      %cst_68 = arith.constant dense<0.000000e+00> : vector<16x32xf32>
      %63 = tpu.matmul %0, %62, %cst_68 {dimension_numbers = #tpu.dot_dimension_numbers<[1], [0], [0], [1], [0, 0, 1, 1], [], []>} : vector<16x16xf32>, vector<16x32xf32>, vector<16x32xf32> -> vector<16x32xf32>
      %c2_69 = arith.constant 2 : index
      %c0_70 = arith.constant 0 : index
      %c0_71 = arith.constant 0 : index
      %c0_72 = arith.constant 0 : index
      %64 = vector.load %arg4[%c2_69, %c0_70, %c0_71, %c0_72] : memref<4x3x32x32xf32, #tpu.memory_space<vmem>>, vector<1x1x32x32xf32>
      %65 = vector.shape_cast %64 : vector<1x1x32x32xf32> to vector<32x32xf32>
      %cst_73 = arith.constant dense<0.000000e+00> : vector<16x32xf32>
      %66 = tpu.matmul %arg14, %65, %cst_73 {dimension_numbers = #tpu.dot_dimension_numbers<[1], [0], [0], [1], [0, 0, 1, 1], [], []>} : vector<16x32xf32>, vector<32x32xf32>, vector<16x32xf32> -> vector<16x32xf32>
      %c2_74 = arith.constant 2 : index
      %c0_75 = arith.constant 0 : index
      %c0_76 = arith.constant 0 : index
      %c0_77 = arith.constant 0 : index
      %67 = vector.load %arg5[%c2_74, %c0_75, %c0_76, %c0_77] : memref<4x3x1x32xf32, #tpu.memory_space<vmem>>, vector<1x1x1x32xf32>
      %68 = vector.shape_cast %67 : vector<1x1x1x32xf32> to vector<1x32xf32>
      %69 = vector.broadcast %68 : vector<1x32xf32> to vector<16x32xf32>
      %70 = arith.addf %66, %69 : vector<16x32xf32>
      %cst_78 = arith.constant 0.000000e+00 : f32
      %71 = vector.broadcast %cst_78 : f32 to vector<16x32xf32>
      %72 = arith.maximumf %70, %71 : vector<16x32xf32>
      %c2_79 = arith.constant 2 : index
      %c1_80 = arith.constant 1 : index
      %c0_81 = arith.constant 0 : index
      %c0_82 = arith.constant 0 : index
      %73 = vector.load %arg4[%c2_79, %c1_80, %c0_81, %c0_82] : memref<4x3x32x32xf32, #tpu.memory_space<vmem>>, vector<1x1x32x32xf32>
      %74 = vector.shape_cast %73 : vector<1x1x32x32xf32> to vector<32x32xf32>
      %cst_83 = arith.constant dense<0.000000e+00> : vector<16x32xf32>
      %75 = tpu.matmul %72, %74, %cst_83 {dimension_numbers = #tpu.dot_dimension_numbers<[1], [0], [0], [1], [0, 0, 1, 1], [], []>} : vector<16x32xf32>, vector<32x32xf32>, vector<16x32xf32> -> vector<16x32xf32>
      %c2_84 = arith.constant 2 : index
      %c1_85 = arith.constant 1 : index
      %c0_86 = arith.constant 0 : index
      %c0_87 = arith.constant 0 : index
      %76 = vector.load %arg5[%c2_84, %c1_85, %c0_86, %c0_87] : memref<4x3x1x32xf32, #tpu.memory_space<vmem>>, vector<1x1x1x32xf32>
      %77 = vector.shape_cast %76 : vector<1x1x1x32xf32> to vector<1x32xf32>
      %78 = vector.broadcast %77 : vector<1x32xf32> to vector<16x32xf32>
      %79 = arith.addf %75, %78 : vector<16x32xf32>
      %cst_88 = arith.constant 0.000000e+00 : f32
      %80 = vector.broadcast %cst_88 : f32 to vector<16x32xf32>
      %81 = arith.maximumf %79, %80 : vector<16x32xf32>
      %c2_89 = arith.constant 2 : index
      %c2_90 = arith.constant 2 : index
      %c0_91 = arith.constant 0 : index
      %c0_92 = arith.constant 0 : index
      %82 = vector.load %arg4[%c2_89, %c2_90, %c0_91, %c0_92] : memref<4x3x32x32xf32, #tpu.memory_space<vmem>>, vector<1x1x32x32xf32>
      %83 = vector.shape_cast %82 : vector<1x1x32x32xf32> to vector<32x32xf32>
      %cst_93 = arith.constant dense<0.000000e+00> : vector<16x32xf32>
      %84 = tpu.matmul %81, %83, %cst_93 {dimension_numbers = #tpu.dot_dimension_numbers<[1], [0], [0], [1], [0, 0, 1, 1], [], []>} : vector<16x32xf32>, vector<32x32xf32>, vector<16x32xf32> -> vector<16x32xf32>
      %c2_94 = arith.constant 2 : index
      %c2_95 = arith.constant 2 : index
      %c0_96 = arith.constant 0 : index
      %c0_97 = arith.constant 0 : index
      %85 = vector.load %arg5[%c2_94, %c2_95, %c0_96, %c0_97] : memref<4x3x1x32xf32, #tpu.memory_space<vmem>>, vector<1x1x1x32xf32>
      %86 = vector.shape_cast %85 : vector<1x1x1x32xf32> to vector<1x32xf32>
      %87 = vector.broadcast %86 : vector<1x32xf32> to vector<16x32xf32>
      %88 = arith.addf %84, %87 : vector<16x32xf32>
      %c3 = arith.constant 3 : index
      %c0_98 = arith.constant 0 : index
      %c0_99 = arith.constant 0 : index
      %c0_100 = arith.constant 0 : index
      %89 = vector.load %arg4[%c3, %c0_98, %c0_99, %c0_100] : memref<4x3x32x32xf32, #tpu.memory_space<vmem>>, vector<1x1x32x32xf32>
      %90 = vector.shape_cast %89 : vector<1x1x32x32xf32> to vector<32x32xf32>
      %cst_101 = arith.constant dense<0.000000e+00> : vector<16x32xf32>
      %91 = tpu.matmul %arg14, %90, %cst_101 {dimension_numbers = #tpu.dot_dimension_numbers<[1], [0], [0], [1], [0, 0, 1, 1], [], []>} : vector<16x32xf32>, vector<32x32xf32>, vector<16x32xf32> -> vector<16x32xf32>
      %c3_102 = arith.constant 3 : index
      %c0_103 = arith.constant 0 : index
      %c0_104 = arith.constant 0 : index
      %c0_105 = arith.constant 0 : index
      %92 = vector.load %arg5[%c3_102, %c0_103, %c0_104, %c0_105] : memref<4x3x1x32xf32, #tpu.memory_space<vmem>>, vector<1x1x1x32xf32>
      %93 = vector.shape_cast %92 : vector<1x1x1x32xf32> to vector<1x32xf32>
      %94 = vector.broadcast %93 : vector<1x32xf32> to vector<16x32xf32>
      %95 = arith.addf %91, %94 : vector<16x32xf32>
      %cst_106 = arith.constant 0.000000e+00 : f32
      %96 = vector.broadcast %cst_106 : f32 to vector<16x32xf32>
      %97 = arith.maximumf %95, %96 : vector<16x32xf32>
      %c3_107 = arith.constant 3 : index
      %c1_108 = arith.constant 1 : index
      %c0_109 = arith.constant 0 : index
      %c0_110 = arith.constant 0 : index
      %98 = vector.load %arg4[%c3_107, %c1_108, %c0_109, %c0_110] : memref<4x3x32x32xf32, #tpu.memory_space<vmem>>, vector<1x1x32x32xf32>
      %99 = vector.shape_cast %98 : vector<1x1x32x32xf32> to vector<32x32xf32>
      %cst_111 = arith.constant dense<0.000000e+00> : vector<16x32xf32>
      %100 = tpu.matmul %97, %99, %cst_111 {dimension_numbers = #tpu.dot_dimension_numbers<[1], [0], [0], [1], [0, 0, 1, 1], [], []>} : vector<16x32xf32>, vector<32x32xf32>, vector<16x32xf32> -> vector<16x32xf32>
      %c3_112 = arith.constant 3 : index
      %c1_113 = arith.constant 1 : index
      %c0_114 = arith.constant 0 : index
      %c0_115 = arith.constant 0 : index
      %101 = vector.load %arg5[%c3_112, %c1_113, %c0_114, %c0_115] : memref<4x3x1x32xf32, #tpu.memory_space<vmem>>, vector<1x1x1x32xf32>
      %102 = vector.shape_cast %101 : vector<1x1x1x32xf32> to vector<1x32xf32>
      %103 = vector.broadcast %102 : vector<1x32xf32> to vector<16x32xf32>
      %104 = arith.addf %100, %103 : vector<16x32xf32>
      %cst_116 = arith.constant 0.000000e+00 : f32
      %105 = vector.broadcast %cst_116 : f32 to vector<16x32xf32>
      %106 = arith.maximumf %104, %105 : vector<16x32xf32>
      %c3_117 = arith.constant 3 : index
      %c2_118 = arith.constant 2 : index
      %c0_119 = arith.constant 0 : index
      %c0_120 = arith.constant 0 : index
      %107 = vector.load %arg4[%c3_117, %c2_118, %c0_119, %c0_120] : memref<4x3x32x32xf32, #tpu.memory_space<vmem>>, vector<1x1x32x32xf32>
      %108 = vector.shape_cast %107 : vector<1x1x32x32xf32> to vector<32x32xf32>
      %cst_121 = arith.constant dense<0.000000e+00> : vector<16x32xf32>
      %109 = tpu.matmul %106, %108, %cst_121 {dimension_numbers = #tpu.dot_dimension_numbers<[1], [0], [0], [1], [0, 0, 1, 1], [], []>} : vector<16x32xf32>, vector<32x32xf32>, vector<16x32xf32> -> vector<16x32xf32>
      %c3_122 = arith.constant 3 : index
      %c2_123 = arith.constant 2 : index
      %c0_124 = arith.constant 0 : index
      %c0_125 = arith.constant 0 : index
      %110 = vector.load %arg5[%c3_122, %c2_123, %c0_124, %c0_125] : memref<4x3x1x32xf32, #tpu.memory_space<vmem>>, vector<1x1x1x32xf32>
      %111 = vector.shape_cast %110 : vector<1x1x1x32xf32> to vector<1x32xf32>
      %112 = vector.broadcast %111 : vector<1x32xf32> to vector<16x32xf32>
      %113 = arith.addf %109, %112 : vector<16x32xf32>
      %114 = tpu.concatenate %88, %113 in 0 : vector<16x32xf32>, vector<16x32xf32> -> vector<32x32xf32>
      %cst_126 = arith.constant dense<0.000000e+00> : vector<8x32xf32>
      %115 = tpu.matmul %1, %114, %cst_126 {dimension_numbers = #tpu.dot_dimension_numbers<[1], [0], [0], [1], [0, 0, 1, 1], [], []>} : vector<8x32xf32>, vector<32x32xf32>, vector<8x32xf32> -> vector<8x32xf32>
      %116 = tpu.concatenate %115, %115 in 0 : vector<8x32xf32>, vector<8x32xf32> -> vector<16x32xf32>
      %c0_127 = arith.constant 0 : index
      %c0_128 = arith.constant 0 : index
      %c0_129 = arith.constant 0 : index
      %117 = vector.load %arg6[%c0_127, %c0_128, %c0_129] : memref<2x32x128xf32, #tpu.memory_space<vmem>>, vector<1x32x128xf32>
      %118 = vector.shape_cast %117 : vector<1x32x128xf32> to vector<32x128xf32>
      %cst_130 = arith.constant dense<0.000000e+00> : vector<16x128xf32>
      %119 = tpu.matmul %116, %118, %cst_130 {dimension_numbers = #tpu.dot_dimension_numbers<[1], [0], [0], [1], [0, 0, 1, 1], [], []>} : vector<16x32xf32>, vector<32x128xf32>, vector<16x128xf32> -> vector<16x128xf32>
      %c0_131 = arith.constant 0 : index
      %c0_132 = arith.constant 0 : index
      %c0_133 = arith.constant 0 : index
      %120 = vector.load %arg7[%c0_131, %c0_132, %c0_133] : memref<2x32x128xf32, #tpu.memory_space<vmem>>, vector<1x32x128xf32>
      %121 = vector.shape_cast %120 : vector<1x32x128xf32> to vector<32x128xf32>
      %cst_134 = arith.constant dense<0.000000e+00> : vector<16x128xf32>
      %122 = tpu.matmul %arg12, %121, %cst_134 {dimension_numbers = #tpu.dot_dimension_numbers<[1], [0], [0], [1], [0, 0, 1, 1], [], []>} : vector<16x32xf32>, vector<32x128xf32>, vector<16x128xf32> -> vector<16x128xf32>
      %123 = arith.addf %119, %122 : vector<16x128xf32>
      %c0_135 = arith.constant 0 : index
      %c0_136 = arith.constant 0 : index
      %c0_137 = arith.constant 0 : index
      %124 = vector.load %arg8[%c0_135, %c0_136, %c0_137] : memref<2x1x128xf32, #tpu.memory_space<vmem>>, vector<1x1x128xf32>
      %125 = vector.shape_cast %124 : vector<1x1x128xf32> to vector<1x128xf32>
      %126 = vector.broadcast %125 : vector<1x128xf32> to vector<16x128xf32>
      %127 = arith.addf %123, %126 : vector<16x128xf32>
      %128 = vector.extract_strided_slice %127 {offsets = [0, 0], sizes = [16, 32], strides = [1, 1]} : vector<16x128xf32> to vector<16x32xf32>
      %129 = arith.negf %128 : vector<16x32xf32>
      %130 = math.exp %129 : vector<16x32xf32>
      %cst_138 = arith.constant 1.000000e+00 : f32
      %131 = vector.broadcast %cst_138 : f32 to vector<16x32xf32>
      %132 = arith.addf %131, %130 : vector<16x32xf32>
      %133 = arith.divf %131, %132 : vector<16x32xf32>
      %134 = vector.extract_strided_slice %127 {offsets = [0, 32], sizes = [16, 32], strides = [1, 1]} : vector<16x128xf32> to vector<16x32xf32>
      %135 = arith.negf %134 : vector<16x32xf32>
      %136 = math.exp %135 : vector<16x32xf32>
      %cst_139 = arith.constant 1.000000e+00 : f32
      %137 = vector.broadcast %cst_139 : f32 to vector<16x32xf32>
      %138 = arith.addf %137, %136 : vector<16x32xf32>
      %139 = arith.divf %137, %138 : vector<16x32xf32>
      %140 = vector.extract_strided_slice %127 {offsets = [0, 64], sizes = [16, 32], strides = [1, 1]} : vector<16x128xf32> to vector<16x32xf32>
      %141 = math.tanh %140 : vector<16x32xf32>
      %142 = vector.extract_strided_slice %127 {offsets = [0, 96], sizes = [16, 32], strides = [1, 1]} : vector<16x128xf32> to vector<16x32xf32>
      %143 = arith.negf %142 : vector<16x32xf32>
      %144 = math.exp %143 : vector<16x32xf32>
      %cst_140 = arith.constant 1.000000e+00 : f32
      %145 = vector.broadcast %cst_140 : f32 to vector<16x32xf32>
      %146 = arith.addf %145, %144 : vector<16x32xf32>
      %147 = arith.divf %145, %146 : vector<16x32xf32>
      %148 = arith.mulf %139, %arg13 : vector<16x32xf32>
      %149 = arith.mulf %133, %141 : vector<16x32xf32>
      %150 = arith.addf %148, %149 : vector<16x32xf32>
      %151 = math.tanh %150 : vector<16x32xf32>
      %152 = arith.mulf %147, %151 : vector<16x32xf32>
      %c1_141 = arith.constant 1 : index
      %c0_142 = arith.constant 0 : index
      %c0_143 = arith.constant 0 : index
      %153 = vector.load %arg6[%c1_141, %c0_142, %c0_143] : memref<2x32x128xf32, #tpu.memory_space<vmem>>, vector<1x32x128xf32>
      %154 = vector.shape_cast %153 : vector<1x32x128xf32> to vector<32x128xf32>
      %cst_144 = arith.constant dense<0.000000e+00> : vector<16x128xf32>
      %155 = tpu.matmul %63, %154, %cst_144 {dimension_numbers = #tpu.dot_dimension_numbers<[1], [0], [0], [1], [0, 0, 1, 1], [], []>} : vector<16x32xf32>, vector<32x128xf32>, vector<16x128xf32> -> vector<16x128xf32>
      %c1_145 = arith.constant 1 : index
      %c0_146 = arith.constant 0 : index
      %c0_147 = arith.constant 0 : index
      %156 = vector.load %arg7[%c1_145, %c0_146, %c0_147] : memref<2x32x128xf32, #tpu.memory_space<vmem>>, vector<1x32x128xf32>
      %157 = vector.shape_cast %156 : vector<1x32x128xf32> to vector<32x128xf32>
      %cst_148 = arith.constant dense<0.000000e+00> : vector<16x128xf32>
      %158 = tpu.matmul %arg14, %157, %cst_148 {dimension_numbers = #tpu.dot_dimension_numbers<[1], [0], [0], [1], [0, 0, 1, 1], [], []>} : vector<16x32xf32>, vector<32x128xf32>, vector<16x128xf32> -> vector<16x128xf32>
      %159 = arith.addf %155, %158 : vector<16x128xf32>
      %c1_149 = arith.constant 1 : index
      %c0_150 = arith.constant 0 : index
      %c0_151 = arith.constant 0 : index
      %160 = vector.load %arg8[%c1_149, %c0_150, %c0_151] : memref<2x1x128xf32, #tpu.memory_space<vmem>>, vector<1x1x128xf32>
      %161 = vector.shape_cast %160 : vector<1x1x128xf32> to vector<1x128xf32>
      %162 = vector.broadcast %161 : vector<1x128xf32> to vector<16x128xf32>
      %163 = arith.addf %159, %162 : vector<16x128xf32>
      %164 = vector.extract_strided_slice %163 {offsets = [0, 0], sizes = [16, 32], strides = [1, 1]} : vector<16x128xf32> to vector<16x32xf32>
      %165 = arith.negf %164 : vector<16x32xf32>
      %166 = math.exp %165 : vector<16x32xf32>
      %cst_152 = arith.constant 1.000000e+00 : f32
      %167 = vector.broadcast %cst_152 : f32 to vector<16x32xf32>
      %168 = arith.addf %167, %166 : vector<16x32xf32>
      %169 = arith.divf %167, %168 : vector<16x32xf32>
      %170 = vector.extract_strided_slice %163 {offsets = [0, 32], sizes = [16, 32], strides = [1, 1]} : vector<16x128xf32> to vector<16x32xf32>
      %171 = arith.negf %170 : vector<16x32xf32>
      %172 = math.exp %171 : vector<16x32xf32>
      %cst_153 = arith.constant 1.000000e+00 : f32
      %173 = vector.broadcast %cst_153 : f32 to vector<16x32xf32>
      %174 = arith.addf %173, %172 : vector<16x32xf32>
      %175 = arith.divf %173, %174 : vector<16x32xf32>
      %176 = vector.extract_strided_slice %163 {offsets = [0, 64], sizes = [16, 32], strides = [1, 1]} : vector<16x128xf32> to vector<16x32xf32>
      %177 = math.tanh %176 : vector<16x32xf32>
      %178 = vector.extract_strided_slice %163 {offsets = [0, 96], sizes = [16, 32], strides = [1, 1]} : vector<16x128xf32> to vector<16x32xf32>
      %179 = arith.negf %178 : vector<16x32xf32>
      %180 = math.exp %179 : vector<16x32xf32>
      %cst_154 = arith.constant 1.000000e+00 : f32
      %181 = vector.broadcast %cst_154 : f32 to vector<16x32xf32>
      %182 = arith.addf %181, %180 : vector<16x32xf32>
      %183 = arith.divf %181, %182 : vector<16x32xf32>
      %184 = arith.mulf %175, %arg15 : vector<16x32xf32>
      %185 = arith.mulf %169, %177 : vector<16x32xf32>
      %186 = arith.addf %184, %185 : vector<16x32xf32>
      %187 = math.tanh %186 : vector<16x32xf32>
      %188 = arith.mulf %183, %187 : vector<16x32xf32>
      scf.yield %152, %150, %188, %186 : vector<16x32xf32>, vector<16x32xf32>, vector<16x32xf32>, vector<16x32xf32>
    }
    %c0_8 = arith.constant 0 : index
    %c0_9 = arith.constant 0 : index
    %8 = vector.load %arg9[%c0_8, %c0_9] : memref<16x32xf32, #tpu.memory_space<vmem>>, vector<16x32xf32>
    tpu.vector_store %arg9[%c0_8, %c0_9], %7#0 {strides = array<i32>} : memref<16x32xf32, #tpu.memory_space<vmem>>, vector<16x32xf32>,
    %c0_10 = arith.constant 0 : index
    %c0_11 = arith.constant 0 : index
    %9 = vector.load %arg10[%c0_10, %c0_11] : memref<16x32xf32, #tpu.memory_space<vmem>>, vector<16x32xf32>
    tpu.vector_store %arg10[%c0_10, %c0_11], %7#2 {strides = array<i32>} : memref<16x32xf32, #tpu.memory_space<vmem>>, vector<16x32xf32>,
    return
  }
}

</mosaic_0001>

<bundles_post_ra>
// kernel: gms_forward.1
= control target key start
LH: loop header
LB: loop body
LE: loop exit
PB: predicated region body
PF: predicated region fallthrough
CT: control target
= control target key end

     0   :  { %16 = vsyncpa [#allocation3], 0  ;;  %v2640_v7 = vmov 0.0   ;;  %v2642_v8 = vmov 0.0   ;;  %v2648_v9 = vmov 0.0   ;;  %v2650_v10 = vmov 0.0   ;;  %s3056_s0 = inlined_call_operand.vmem [shape: f32[16,32], index: 0, kind: input, shape index: {}]   ;;  %s3057_s1 = inlined_call_operand.vmem [shape: f32[16,32], index: 1, kind: input, shape index: {}]   ;;  %s3058_s2 = inlined_call_operand.vmem [shape: f32[16,16], index: 2, kind: input, shape index: {}]   ;;  %s3059_s3 = inlined_call_operand.vmem [shape: f32[8,32], index: 3, kind: input, shape index: {}]   ;;  %s3060_s4 = inlined_call_operand.vmem [shape: f32[4,3,32,32], index: 4, kind: input, shape index: {}]   ;;  %s3061_s5 = inlined_call_operand.vmem [shape: f32[4,3,1,32], index: 5, kind: input, shape index: {}]   ;;  %s3062_s6 = inlined_call_operand.vmem [shape: f32[2,32,128], index: 6, kind: input, shape index: {}]   ;;  %s3063_s7 = inlined_call_operand.vmem [shape: f32[2,32,128], index: 7, kind: input, shape index: {}]   ;;  %s3064_s8 = inlined_call_operand.vmem [shape: f32[2,1,128], index: 8, kind: input, shape index: {}]   ;;  %s3065_s9 = inlined_call_operand.vmem [shape: f32[16,32], index: 9, kind: output, shape index: {0}]   ;;  %s3066_s10 = inlined_call_operand.hbm [shape: f32[16,32], index: 10, kind: output, shape index: {1}]  }
   0x1   :  { %v2616_v0 = vld [vmem:[%s3058_s2] sm:$0xff]  ;;  %v2621_v1 = vld [vmem:[%s3058_s2 + $0x8] sm:$0xff] }
   0x2   :  { %v2626_v2 = vld [vmem:[%s3059_s3] sm:$0xff]  ;;  %v39_v4 = vld [vmem:[%s3056_s0 + $0x8] sm:$0xff]  }
   0x3   :  { %v38_v3 = vld [vmem:[%s3056_s0] sm:$0xff]   ;;  %v41_v6 = vld [vmem:[%s3057_s1 + $0x8] sm:$0xff]   ;;  %s2656_s0 = smov 0  }
   0x4   :  { %v40_v5 = vld [vmem:[%s3057_s1] sm:$0xff]  }
   0x5 LB: > { %v56_v11 = vld [vmem:[%s3060_s4] sm:$0xff]  ;;  %v57_v12 = vld [vmem:[%s3060_s4 + $0x8] sm:$0xff]  ;;  %v58_v13 = vld [vmem:[%s3060_s4 + $0x10] sm:$0xff]  ;;  %v2550_v14 = vmov 0.0|0.0   ;;  %vm2551_vm0 = vmmov 0   ;;  %v2552_v17 = vmov 0.0   ;;  %s2548_s0 = sphi %s2656_s0, %s47_s0   ;;  %v2544_v3 = vphi %v38_v3, %v3070_v3   ;;  %v2540_v4 = vphi %v39_v4, %v3069_v4   ;;  %v2536_v10 = vphi %v2650_v10, %v1500_v10   ;;  %v2532_v9 = vphi %v2648_v9, %v1501_v9   ;;  %v2528_v5 = vphi %v40_v5, %v3068_v5   ;;  %v2524_v6 = vphi %v41_v6, %v3067_v6   ;;  %v2520_v8 = vphi %v2642_v8, %v1724_v8   ;;  %v2516_v7 = vphi %v2640_v7, %v1725_v7  }
   0x6   : > { %2212 = vmatprep.subr.bf16.mxu0 %v2550_v14  ;;  %v2213_v15 = vpack.c.bf16 %v57_v12, %v56_v11  ;;  %v59_v16 = vld [vmem:[%s3060_s4 + $0x18] sm:$0xff]  ;;  %2026 = vmatprep.mubr.msk.f32.mxu0 %vm2551_vm0, %v2552_v17  ;;  %v1810_v18 = vld [vmem:[%s3060_s4 + $0x20] sm:$0xff]  ;;  %v1811_v19 = vld [vmem:[%s3060_s4 + $0x28] sm:$0xff]  ;;  %vm67_vm1 = vcmask 261120   ;;  %vm575_vm2 = vcmask 130048   ;;  %s2553_s20 = smov 64  }
   0x7   : > { %2218 = vmatprep.subr.bf16.mxu1 %v2550_v14  ;;  %v2219_v20 = vpack.c.bf16 %v1811_v19, %v1810_v18  ;;  %2037 = vmatprep.mubr.msk.f32.mxu1 %vm2551_vm0, %v2552_v17  ;;  %v2216_v21 = vpack.c.bf16 %v59_v16, %v58_v13  ;;  %v1812_v22 = vld [vmem:[%s3060_s4 + $0x30] sm:$0xff]  ;;  %v1813_v23 = vld [vmem:[%s3060_s4 + $0x38] sm:$0xff]  ;;  %v1817_v25 = vld [vmem:[%s3060_s4 + $0x40] sm:$0xff]  ;;  %s2554_s23 = smov 32   ;;  %s47_s0 = sadd.s32 1, %s2548_s0  }
   0x8   : > { %2214 = vmatpush3.bf16.msra.mxu0 %v2213_v15  ;;  %v2222_v24 = vpack.c.bf16 %v1813_v23, %v1812_v22  ;;  %v1818_v26 = vld [vmem:[%s3060_s4 + $0x48] sm:$0xff]  ;;  %v1808_v28 = vld [vmem:[%s3061_s5] ss:$0 sm:$0xff]  ;;  %v1826_v36 = vld [vmem:[%s3060_s4 + $0x70] sm:$0xff]  ;;  %p44_p0 = scmp.ge.s32.totalorder %s47_s0, 2  }
   0x9   : > { %2215 = vmatprep.subr.bf16.mxu0 %v2550_v14  ;;  %2220 = vmatpush3.bf16.msra.mxu1 %v2219_v20  ;;  %v2225_v27 = vpack.c.bf16 %v1818_v26, %v1817_v25  ;;  %v1824_v29 = vld [vmem:[%s3060_s4 + $0x60] sm:$0xff]  ;;  %v1825_v30 = vld [vmem:[%s3060_s4 + $0x68] sm:$0xff]  ;;  %v1827_v37 = vld [vmem:[%s3060_s4 + $0x78] sm:$0xff]  ;;  %s2555_s3 = smov (%p44_p0), [#allocation2]  }
   0xa   : > { %2221 = vmatprep.subr.bf16.mxu1 %v2550_v14  ;;  %v2231_v34 = vpack.c.bf16 %v1825_v30, %v1824_v29  ;;  %v2234_v38 = vpack.c.bf16 %v1827_v37, %v1826_v36  ;;  %v1819_v39 = vld [vmem:[%s3060_s4 + $0x50] sm:$0xff]  ;;  %v1820_v40 = vld [vmem:[%s3060_s4 + $0x58] sm:$0xff]  ;;  %v1815_v42 = vld [vmem:[%s3061_s5 + $0x1] ss:$0 sm:$0xff]  ;;  %s1766_s26 = sshll.u32 (%p44_p0), %s2555_s3, 4  ;;  %s1767_s26 = int_to_ptr.vmem [resolvable:$true] %s1766_s26 }
   0xb   : > { %v2228_v41 = vpack.c.bf16 %v1820_v40, %v1819_v39  ;;  %v1831_v43 = vld [vmem:[%s3060_s4 + $0x80] sm:$0xff]  ;;  %v1832_v44 = vld [vmem:[%s3060_s4 + $0x88] sm:$0xff]  ;;  %v1833_v50 = vld [vmem:[%s3060_s4 + $0x90] sm:$0xff]  ;;  %s2454_s27 = scalar_lea.vmem (%p44_p0), %s1767_s26, 256  ;;  %p2459_p2 = scmp.lt.s32.totalorder (%p44_p0), %s1767_s26, %s1767_s26 }
   0xc   : > { %2217 = vmatpush3.bf16.msra.mxu0 %v2216_v21  ;;  %v2237_v48 = vpack.c.bf16 %v1832_v44, %v1831_v43  ;;  %v1834_v51 = vld [vmem:[%s3060_s4 + $0x98] sm:$0xff]  ;;  %v1829_v52 = vld [vmem:[%s3061_s5 + $0x3] ss:$0 sm:$0xff]  ;;  %v1839_v59 = vld [vmem:[%s3060_s4 + $0xa8] sm:$0xff]  ;;  %p2455_p1 = scmp.ne.s32.totalorder (%p44_p0), %s1767_s26, %s2454_s27  ;;  %p2460_p3 = scmp.lt.s32.totalorder (%p44_p0), %s2454_s27, %s2454_s27 }
   0xd   : > { %2224 = vmatprep.subr.bf16.mxu0 %v2550_v14  ;;  %2223 = vmatpush3.bf16.msra.mxu1 %v2222_v24  ;;  %v2240_v53 = vpack.c.bf16 %v1834_v51, %v1833_v50  ;;  %v1838_v58 = vld [vmem:[%s3060_s4 + $0xa0] sm:$0xff]  ;;  %v1840_v61 = vld [vmem:[%s3060_s4 + $0xb0] sm:$0xff]  ;;  %v1841_v62 = vld [vmem:[%s3060_s4 + $0xb8] sm:$0xff] }
   0xe   : > { %2230 = vmatprep.subr.bf16.mxu1 %v2550_v14  ;;  %v2243_v60 = vpack.c.bf16 %v1839_v59, %v1838_v58  ;;  %v2246_v63 = vpack.c.bf16 %v1841_v62, %v1840_v61  ;;  %v1847_v11 = vld [vmem:[%s3060_s4 + $0xc0] sm:$0xff]  ;;  %v1848_v12 = vld [vmem:[%s3060_s4 + $0xc8] sm:$0xff]  ;;  %v1849_v20 = vld [vmem:[%s3060_s4 + $0xd0] sm:$0xff]  ;;  %p2461_p4 = por (%p44_p0), %p2460_p3, %p2459_p2 }
   0xf   : > { %2027 = vmatmul.mubr.msk.f32.vlgmr.msra.gmra.mrb[0].mxu0 %vm67_vm1, %v2544_v3  ;;  %v2252_v13 = vpack.c.bf16 %v1848_v12, %v1847_v11  ;;  %v1836_v18 = vld [vmem:[%s3061_s5 + $0x4] ss:$0 sm:$0xff]  ;;  %v1850_v21 = vld [vmem:[%s3060_s4 + $0xd8] sm:$0xff]  ;;  %v1822_v26 = vld [vmem:[%s3061_s5 + $0x2] ss:$0 sm:$0xff] }
  0x10   : > { %2048 = vmatprep.mubr.msk.f32.mxu0 %vm2551_vm0, %v2552_v17  ;;  %2226 = vmatpush3.bf16.msra.mxu0 %v2225_v27  ;;  %v2256_v25 = vpack.c.bf16 %v1850_v21, %v1849_v20  ;;  %v1843_v27 = vld [vmem:[%s3061_s5 + $0x5] ss:$0 sm:$0xff]  ;;  %v1856_v30 = vld [vmem:[%s3060_s4 + $0xe8] sm:$0xff]  ;;  %v1857_v36 = vld [vmem:[%s3060_s4 + $0xf0] sm:$0xff]  ;;  %p2462_p5 = pnand (%p44_p0), %p2461_p4, %p2455_p1 }
  0x11   : > { %2227 = vmatprep.subr.bf16.mxu0 %v2550_v14  ;;  %v1855_v29 = vld [vmem:[%s3060_s4 + $0xe0] sm:$0xff]  ;;  %v1858_v37 = vld [vmem:[%s3060_s4 + $0xf8] sm:$0xff]  ;;  %v1880_v59 = vld [vmem:[%s3060_s4 + $0x148] sm:$0xff] }
  0x12   : > { %v2264_v39 = vpack.c.bf16 %v1858_v37, %v1857_v36  ;;  %v1879_v58 = vld [vmem:[%s3060_s4 + $0x140] sm:$0xff] }
  0x14   : > { %2229 = vmatpush3.bf16.msra.mxu0 %v2228_v41  ;;  %v1871_v41 = vld [vmem:[%s3060_s4 + $0x120] sm:$0xff] }
  0x15   : > { %2236 = vmatprep.subr.bf16.mxu0 %v2550_v14 }
  0xe2   : > { %v137_v31 = vpop.f32.mrb[0].mxu0 }
  0xe3   : > { %v138_v32 = vadd.f32 %v1808_v28, %v137_v31  ;;  %v2028_v33 = vpop.f32.mrb[1].mxu0 }
  0xe5   : > { %v141_v35 = vmax.f32 %v138_v32, 0.0 }
  0xe7   : > { %2038 = vmatmul.mubr.msk.f32.vlgmr.msra.gmra.mrb[0].mxu1 %vm67_vm1, %v141_v35  ;;  %v2260_v35 = vpack.c.bf16 %v1856_v30, %v1855_v29  ;;  %v1887_v29 = vld [vmem:[%s3060_s4 + $0x160] sm:$0xff]  ;;  %v1888_v30 = vld [vmem:[%s3060_s4 + $0x168] sm:$0xff] }
  0xe8   : > { %2232 = vmatpush3.bf16.msra.mxu1 %v2231_v34  ;;  %2059 = vmatprep.mubr.msk.f32.mxu1 %vm2551_vm0, %v2552_v17 }
  0xe9   : > { %2233 = vmatprep.subr.bf16.mxu1 %v2550_v14 }
  0xec   : > { %2235 = vmatpush3.bf16.msra.mxu1 %v2234_v38  ;;  %v1852_v38 = vld [vmem:[%s3061_s5 + $0x6] ss:$0 sm:$0xff] }
  0xed   : > { %2242 = vmatprep.subr.bf16.mxu1 %v2550_v14 }
  0xef   : > { %2060 = vmatmul.mubr.msk.f32.vlgmr.msra.gmra.mrb[2].mxu1 %vm67_vm1, %v2540_v4 }
  0xf0   : > { %2081 = vmatprep.mubr.msk.f32.mxu1 %vm2551_vm0, %v2552_v17  ;;  %2244 = vmatpush3.bf16.msra.mxu1 %v2243_v60  ;;  %v2284_v60 = vpack.c.bf16 %v1880_v59, %v1879_v58  ;;  %v1907_v59 = vld [vmem:[%s3063_s7 + $0x20] sm:$0xff] }
  0xf1   : > { %2245 = vmatprep.subr.bf16.mxu1 %v2550_v14 }
  0xf4   : > { %2247 = vmatpush3.bf16.msra.mxu1 %v2246_v63  ;;  %v1860_v63 = vld [vmem:[%s3061_s5 + $0x7] ss:$0 sm:$0xff] }
  0xf5   : > { %2253 = vmatprep.subr.bf16.mxu1 %v2252_v13 }
 0x1ba   : > { %v224_v45 = vpop.f32.mrb[0].mxu1 }
 0x1bb   : > { %v225_v46 = vadd.f32 %v1815_v42, %v224_v45  ;;  %v2039_v47 = vpop.f32.mrb[1].mxu1  ;;  %v1872_v42 = vld [vmem:[%s3060_s4 + $0x128] sm:$0xff] }
 0x1bd   : > { %v228_v49 = vmax.f32 %v225_v46, 0.0  ;;  %v2276_v46 = vpack.c.bf16 %v1872_v42, %v1871_v41 }
 0x1bf   : > { %2049 = vmatmul.mubr.msk.f32.vlgmr.msra.gmra.mrb[2].mxu0 %vm67_vm1, %v228_v49  ;;  %v1874_v49 = vld [vmem:[%s3060_s4 + $0x138] sm:$0xff] }
 0x1c0   : > { %2238 = vmatpush3.bf16.msra.mxu0 %v2237_v48  ;;  %2070 = vmatprep.mubr.msk.f32.mxu0 %vm2551_vm0, %v2552_v17  ;;  %v1873_v48 = vld [vmem:[%s3060_s4 + $0x130] sm:$0xff] }
 0x1c1   : > { %2239 = vmatprep.subr.bf16.mxu0 %v2550_v14  ;;  %v2280_v51 = vpack.c.bf16 %v1874_v49, %v1873_v48  ;;  %v1302_v48 = vld [vmem:[%s3063_s7 + $0x10] sm:$0xff] }
 0x1c2   : > { %v397_v54 = vpop.f32.mrb[2].mxu1 }
 0x1c3   : > { %v398_v55 = vadd.f32 %v1829_v52, %v397_v54  ;;  %v2061_v56 = vpop.f32.mrb[3].mxu1  ;;  %v1863_v52 = vld [vmem:[%s3060_s4 + $0x100] sm:$0xff] }
 0x1c4   : > { %2241 = vmatpush3.bf16.msra.mxu0 %v2240_v53  ;;  %v1864_v53 = vld [vmem:[%s3060_s4 + $0x108] sm:$0xff]  ;;  %v1866_v56 = vld [vmem:[%s3060_s4 + $0x118] sm:$0xff] }
 0x1c5   : > { %v401_v57 = vmax.f32 %v398_v55, 0.0  ;;  %v2268_v54 = vpack.c.bf16 %v1864_v53, %v1863_v52  ;;  %v1865_v55 = vld [vmem:[%s3060_s4 + $0x110] sm:$0xff]  ;;  %v1297_v52 = vld [vmem:[%s3062_s6 + $0x8] sm:$0xff] }
 0x1c7   : > { %2071 = vmatmul.mubr.msk.f32.vlgmr.msra.gmra.mrb[4].mxu0 %vm67_vm1, %v401_v57  ;;  %v2272_v57 = vpack.c.bf16 %v1866_v56, %v1865_v55  ;;  %v1299_v55 = vld [vmem:[%s3062_s6 + $0x18] sm:$0xff] }
 0x1c8   : > { %2088 = vmatprep.mubr.msk.f32.mxu0 %vm575_vm2, %v2616_v0 }
 0x292   : > { %v311_v15 = vpop.f32.mrb[2].mxu0 }
 0x293   : > { %v2050_v16 = vpop.f32.mrb[3].mxu0  ;;  %v312_v31 = vadd.f32 %v1822_v26, %v311_v15 }
 0x294   : > { %v1881_v16 = vld [vmem:[%s3060_s4 + $0x150] sm:$0xff] }
 0x29a   : > { %v484_v19 = vpop.f32.mrb[4].mxu0 }
 0x29b   : > { %v485_v22 = vadd.f32 %v1836_v18, %v484_v19  ;;  %v2072_v23 = vpop.f32.mrb[5].mxu0  ;;  %v1882_v18 = vld [vmem:[%s3060_s4 + $0x158] sm:$0xff] }
 0x29c   : > { %v2288_v21 = vpack.c.bf16 %v1882_v18, %v1881_v16  ;;  %v1910_v16 = vld [vmem:[%s3063_s7 + $0x38] sm:$0xff] }
 0x29d   : > { %v488_v24 = vmax.f32 %v485_v22, 0.0  ;;  %v1876_v22 = vld [vmem:[%s3061_s5 + $0x9] ss:$0 sm:$0xff] }
 0x29f   : > { %2082 = vmatmul.mubr.msk.f32.vlgmr.msra.gmra.mrb[4].mxu1 %vm67_vm1, %v488_v24 }
 0x2a0   : > { %2255 = vmatpush3.bf16.msra.mxu1 %v2252_v13  ;;  %2099 = vmatprep.mubr.msk.f32.mxu1 %vm67_vm1, %v2528_v5 }
 0x2a1   : > { %2257 = vmatprep.subr.bf16.mxu1 %v2256_v25 }
 0x2a4   : > { %2259 = vmatpush3.bf16.msra.mxu1 %v2256_v25 }
 0x2a5   : > { %2269 = vmatprep.subr.bf16.mxu1 %v2268_v54 }
 0x2a7   : > { %2100 = vmatmul.mubr.msk.f32.vlgmr.msra.gmra.mrb[6].mxu1 %vm67_vm1, %v2524_v6 }
 0x2a8   : > { %2271 = vmatpush3.bf16.msra.mxu1 %v2268_v54  ;;  %v1298_v54 = vld [vmem:[%s3062_s6 + $0x10] sm:$0xff] }
 0x2a9   : > { %2273 = vmatprep.subr.bf16.mxu1 %v2272_v57  ;;  %v2318_v56 = vpack.c.bf16 %v1299_v55, %v1298_v54 }
 0x2ac   : > { %2275 = vmatpush3.bf16.msra.mxu1 %v2272_v57  ;;  %v1892_v57 = vld [vmem:[%s3061_s5 + $0xb] ss:$0 sm:$0xff] }
 0x2ad   : > { %2285 = vmatprep.subr.bf16.mxu1 %v2284_v60 }
 0x372   : > { %v571_v28 = vpop.f32.mrb[4].mxu1 }
 0x373   : > { %v572_v32 = vadd.f32 %v1843_v27, %v571_v28  ;;  %v2083_v33 = vpop.f32.mrb[5].mxu1 }
 0x374   : > { %v1890_v33 = vld [vmem:[%s3060_s4 + $0x178] sm:$0xff] }
 0x375   : > { %v2248_v34 = vpack.c.bf16 %v572_v32, %v312_v31  ;;  %v2292_v31 = vpack.c.bf16 %v1888_v30, %v1887_v29  ;;  %v1889_v32 = vld [vmem:[%s3060_s4 + $0x170] sm:$0xff]  ;;  %v1900_v30 = vld [vmem:[%s3064_s8] ss:$0 sm:$0xff] }
 0x377   : > { %2249 = vmatprep.subr.bf16.mxu0 %v2248_v34 }
 0x378   : > { %2251 = vmatpush3.bf16.msra.mxu0 %v2248_v34  ;;  %v1868_v34 = vld [vmem:[%s3061_s5 + $0x8] ss:$0 sm:$0xff] }
 0x379   : > { %2261 = vmatprep.subr.bf16.mxu0 %v2260_v35 }
 0x37a   : > { %v2101_v40 = vpop.f32.mrb[6].mxu1 }
 0x37b   : > { %2089 = vmatmul.mubr.msk.f32.vlgmr.msra.gmra.mrb[6].mxu0 %vm575_vm2, %v2621_v1  ;;  %v748_v43 = vadd.f32 %v2101_v40, %v1852_v38  ;;  %v742_v44 = vpop.f32.mrb[7].mxu1  ;;  %v1884_v40 = vld [vmem:[%s3061_s5 + $0xa] ss:$0 sm:$0xff] }
 0x37c   : > { %2263 = vmatpush3.bf16.msra.mxu0 %v2260_v35  ;;  %v743_v45 = vadd.f32 %v1852_v38, %v742_v44 }
 0x37d   : > { %2265 = vmatprep.subr.bf16.mxu0 %v2264_v39  ;;  %v752_v50 = vmax.f32 %v748_v43, 0.0 }
 0x37e   : > { %v751_v47 = vmax.f32 %v743_v45, 0.0 }
 0x380   : > { %2267 = vmatpush3.bf16.msra.mxu0 %v2264_v39  ;;  %2110 = vmatprep.mubr.msk.f32.mxu0 %vm67_vm1, %v751_v47  ;;  %v1300_v47 = vld [vmem:[%s3063_s7] sm:$0xff] }
 0x381   : > { %2277 = vmatprep.subr.bf16.mxu0 %v2276_v46 }
 0x383   : > { %2111 = vmatmul.mubr.msk.f32.vlgmr.msra.gmra.mrb[8].mxu0 %vm67_vm1, %v752_v50  ;;  %v1303_v50 = vld [vmem:[%s3063_s7 + $0x18] sm:$0xff] }
 0x384   : > { %2279 = vmatpush3.bf16.msra.mxu0 %v2276_v46  ;;  %2132 = vmatprep.mubr.msk.f32.mxu0 %vm67_vm1, %v2528_v5 }
 0x385   : > { %2281 = vmatprep.subr.bf16.mxu0 %v2280_v51 }
 0x388   : > { %2283 = vmatpush3.bf16.msra.mxu0 %v2280_v51  ;;  %v2310_v51 = vpack.c.bf16 %v1303_v50, %v1302_v48 }
 0x389   : > { %2293 = vmatprep.subr.bf16.mxu0 %v2292_v31 }
 0x38b   : > { %2133 = vmatmul.mubr.msk.f32.vlgmr.msra.gmra.mrb[10].mxu0 %vm67_vm1, %v2524_v6 }
 0x38c   : > { %2295 = vmatpush3.bf16.msra.mxu0 %v2292_v31 }
 0x44e   : > { %v2878_v61 = vpop.f32.mrb[6].mxu0 }
 0x44f   : > { %v2880_v62 = vpop.f32.mrb[7].mxu0 }
 0x456   : > { %v2112_v11 = vpop.f32.mrb[8].mxu0 }
 0x457   : > { %v844_v12 = vadd.f32 %v2112_v11, %v1860_v63  ;;  %v838_v13 = vpop.f32.mrb[9].mxu0 }
 0x458   : > { %v839_v15 = vadd.f32 %v1860_v63, %v838_v13 }
 0x459   : > { %v848_v20 = vmax.f32 %v844_v12, 0.0 }
 0x45a   : > { %v847_v19 = vmax.f32 %v839_v15, 0.0  ;;  %v1909_v15 = vld [vmem:[%s3063_s7 + $0x30] sm:$0xff] }
 0x45b   : > { %v2326_v18 = vpack.c.bf16 %v1910_v16, %v1909_v15 }
 0x45c   : > { %2121 = vmatprep.mubr.msk.f32.mxu1 %vm67_vm1, %v847_v19  ;;  %v1903_v19 = vld [vmem:[%s3062_s6 + $0x20] sm:$0xff] }
 0x45d   : > { %2122 = vmatmul.mubr.msk.f32.vlgmr.msra.gmra.mrb[8].mxu1 %vm67_vm1, %v848_v20  ;;  %v1904_v20 = vld [vmem:[%s3062_s6 + $0x28] sm:$0xff] }
 0x45e   : > { %v2134_v23 = vpop.f32.mrb[10].mxu0  ;;  %2287 = vmatpush3.bf16.msra.mxu1 %v2284_v60  ;;  %v1908_v60 = vld [vmem:[%s3063_s7 + $0x28] sm:$0xff] }
 0x45f   : > { %v1028_v24 = vadd.f32 %v2134_v23, %v1876_v22  ;;  %v1022_v25 = vpop.f32.mrb[11].mxu0  ;;  %2289 = vmatprep.subr.bf16.mxu1 %v2288_v21  ;;  %v1906_v23 = vld [vmem:[%s3062_s6 + $0x38] sm:$0xff] }
 0x460   : > { %v1023_v26 = vadd.f32 %v1876_v22, %v1022_v25  ;;  %v1905_v22 = vld [vmem:[%s3062_s6 + $0x30] sm:$0xff] }
 0x461   : > { %v1032_v28 = vmax.f32 %v1028_v24, 0.0  ;;  %v2334_v24 = vpack.c.bf16 %v1906_v23, %v1905_v22 }
 0x462   : > { %v1031_v27 = vmax.f32 %v1023_v26, 0.0  ;;  %2291 = vmatpush3.bf16.msra.mxu1 %v2288_v21  ;;  %v2330_v21 = vpack.c.bf16 %v1904_v20, %v1903_v19  ;;  %v1916_v26 = vld [vmem:[%s3064_s8 + $0x1] ss:$0 sm:$0xff] }
 0x463   : > { %2300 = vmatprep.subr.bf16.mxu1 %v2550_v14 }
 0x464   : > { %2143 = vmatprep.mubr.msk.f32.mxu1 %vm67_vm1, %v1031_v27 }
 0x465   : > { %2144 = vmatmul.mubr.msk.f32.vlgmr.msra.gmra.mrb[10].mxu1 %vm67_vm1, %v1032_v28 }
 0x466   : > { %2165 = vmatprep.mubr.msk.f32.mxu1 %vm2551_vm0, %v2552_v17  ;;  %v2296_v17 = vpack.c.bf16 %v1890_v33, %v1889_v32 }
 0x468   : > { %2297 = vmatprep.subr.bf16.mxu0 %v2296_v17 }
 0x469   : > { %2299 = vmatpush3.bf16.msra.mxu0 %v2296_v17 }
 0x530   : > { %v2123_v35 = vpop.f32.mrb[8].mxu1 }
 0x531   : > { %v940_v36 = vadd.f32 %v2123_v35, %v1868_v34  ;;  %v934_v37 = vpop.f32.mrb[9].mxu1 }
 0x532   : > { %v935_v38 = vadd.f32 %v1868_v34, %v934_v37 }
 0x534   : > { %v2301_v39 = vpack.c.bf16 %v940_v36, %v935_v38 }
 0x536   : > { %2302 = vmatpush3.bf16.msra.mxu1 %v2301_v39 }
 0x537   : > { %2303 = vmatprep.subr.bf16.mxu1 %v2550_v14  ;;  %v1301_v14 = vld [vmem:[%s3063_s7 + $0x8] sm:$0xff] }
 0x538   : > { %v2145_v41 = vpop.f32.mrb[10].mxu1  ;;  %v2306_v49 = vpack.c.bf16 %v1301_v14, %v1300_v47 }
 0x539   : > { %v1124_v42 = vadd.f32 %v2145_v41, %v1884_v40  ;;  %v1118_v43 = vpop.f32.mrb[11].mxu1 }
 0x53a   : > { %v1119_v44 = vadd.f32 %v1884_v40, %v1118_v43  ;;  %2307 = vmatprep.subr.bf16.mxu0 %v2306_v49 }
 0x53b   : > { %v1128_v46 = vmax.f32 %v1124_v42, 0.0 }
 0x53c   : > { %v1127_v45 = vmax.f32 %v1119_v44, 0.0 }
 0x53e   : > { %2154 = vmatprep.mubr.msk.f32.mxu0 %vm67_vm1, %v1127_v45 }
 0x53f   : > { %2155 = vmatmul.mubr.msk.f32.vlgmr.msra.gmra.mrb[12].mxu0 %vm67_vm1, %v1128_v46 }
 0x540   : > { %2176 = vmatprep.mubr.msk.f32.mxu0 %vm67_vm1, %v2544_v3  ;;  %v1296_v3 = vld [vmem:[%s3062_s6] sm:$0xff]  ;;  %2309 = vmatpush3.bf16.msra.mxu0 %v2306_v49 }
 0x541   : > { %2311 = vmatprep.subr.bf16.mxu0 %v2310_v51  ;;  %v2314_v53 = vpack.c.bf16 %v1297_v52, %v1296_v3 }
 0x544   : > { %2313 = vmatpush3.bf16.msra.mxu0 %v2310_v51 }
 0x545   : > { %2315 = vmatprep.subr.bf16.mxu0 %v2314_v53 }
 0x547   : > { %2177 = vmatmul.mubr.msk.f32.vlgmr.msra.gmra.mrb[14].mxu0 %vm67_vm1, %v2540_v4  ;;  %v2322_v4 = vpack.c.bf16 %v1908_v60, %v1907_v59 }
 0x548   : > { %2317 = vmatpush3.bf16.msra.mxu0 %v2314_v53 }
 0x549   : > { %2319 = vmatprep.subr.bf16.mxu0 %v2318_v56 }
 0x54c   : > { %2321 = vmatpush3.bf16.msra.mxu0 %v2318_v56 }
 0x612   : > { %v2156_v58 = vpop.f32.mrb[12].mxu0 }
 0x613   : > { %v1220_v63 = vadd.f32 %v2156_v58, %v1892_v57  ;;  %v1214_v11 = vpop.f32.mrb[13].mxu0 }
 0x614   : > { %v1215_v12 = vadd.f32 %v1892_v57, %v1214_v11 }
 0x616   : > { %v2304_v13 = vpack.c.bf16 %v1220_v63, %v1215_v12 }
 0x618   : > { %2305 = vmatpush3.bf16.msra.mxu1 %v2304_v13 }
 0x619   : > { %2323 = vmatprep.subr.bf16.mxu1 %v2322_v4 }
 0x61b   : > { %2166 = vmatmul.mubr.msk.f32.vlgmr.msra.gmra.mrb[12].mxu1 %vm67_vm1, %v2626_v2 }
 0x61c   : > { %2325 = vmatpush3.bf16.msra.mxu1 %v2322_v4  ;;  %2198 = vmatprep.mubr.msk.f32.mxu1 %vm67_vm1, %v2528_v5 }
 0x61d   : > { %2327 = vmatprep.subr.bf16.mxu1 %v2326_v18 }
 0x620   : > { %2329 = vmatpush3.bf16.msra.mxu1 %v2326_v18 }
 0x621   : > { %2331 = vmatprep.subr.bf16.mxu1 %v2330_v21 }
 0x623   : > { %2199 = vmatmul.mubr.msk.f32.vlgmr.msra.gmra.mrb[14].mxu1 %vm67_vm1, %v2524_v6 }
 0x624   : > { %2333 = vmatpush3.bf16.msra.mxu1 %v2330_v21  ;;  %2209 = vmatprep.mubr.msk.f32.mxu1 %vm67_vm1, %v2880_v62 }
 0x625   : > { %2335 = vmatprep.subr.bf16.mxu1 %v2334_v24 }
 0x628   : > { %2337 = vmatpush3.bf16.msra.mxu1 %v2334_v24 }
 0x62b   : > { %2210 = vmatmul.mubr.msk.f32.vlgmr.msra.gmra.mrb[14].mxu1 %vm67_vm1, %v2878_v61 }
 0x6ee   : > { %v1292_v5 = vpop.f32.mrb[12].mxu1 }
 0x6ef   : > { %v2167_v25 = vpop.f32.mrb[13].mxu1  ;;  %2187 = vmatprep.mubr.msk.f32.mxu0 %vm67_vm1, %v1292_v5 }
 0x6f0   : > { %2188 = vmatmul.mubr.msk.f32.vlgmr.msra.gmra.mrb[14].mxu0 %vm67_vm1, %v1292_v5 }
 0x6fe   : > { %v2211_v6 = vpop.f32.mrb[14].mxu1 }
 0x6ff   : > { %v1671_v27 = vpop.f32.mrb[15].mxu1  ;;  %v1689_v29 = vadd.f32 %v2211_v6, %v1916_v26 }
 0x700   : > { %v1688_v28 = vadd.f32 %v1916_v26, %v1671_v27 }
 0x701   : > { %v1918_v39 = vmul.f32 -1.442695, %v1689_v29 }
 0x702   : > { %2422 = vtanh.f32 %v1688_v28  ;;  %v1917_v37 = vmul.f32 -1.442695, %v1688_v28 }
 0x703   : > { %2424 = vtanh.f32 %v1689_v29 }
 0x70c   : > { %v2423_v62 = vpop.eup %2422 }
 0x70d   : > { %1708 = vrot.lane.b32.xlu1 %v2423_v62, %s2553_s20  ;;  %v2425_v61 = vpop.eup %2424 }
 0x711   : > { %1710 = vrot.lane.b32.xlu1 %v2425_v61, %s2553_s20 }
 0x77f   : > { %v1709_v48 = vpop.permute.xlu1 %1708 }
 0x783   : > { %v1711_v55 = vpop.permute.xlu1 %1710 }
 0x7c3   : > { %v2189_v31 = vpop.f32.mrb[14].mxu0 }
 0x7c4   : > { %v1448_v32 = vpop.f32.mrb[15].mxu0  ;;  %v1465_v17 = vadd.f32 %v2189_v31, %v1900_v30 }
 0x7c5   : > { %v1464_v33 = vadd.f32 %v1900_v30, %v1448_v32 }
 0x7c6   : > { %v1902_v38 = vmul.f32 -1.442695, %v1465_v17 }
 0x7c7   : > { %2426 = vtanh.f32 %v1464_v33  ;;  %v1901_v36 = vmul.f32 -1.442695, %v1464_v33 }
 0x7c8   : > { %2428 = vtanh.f32 %v1465_v17 }
 0x7c9   : > { %2430 = vpow2.f32 %v1901_v36 }
 0x7ca   : > { %2432 = vpow2.f32 %v1917_v37 }
 0x7cb   : > { %2434 = vpow2.f32 %v1902_v38 }
 0x7cc   : > { %2436 = vpow2.f32 %v1918_v39 }
 0x7d1   : > { %v2427_v34 = vpop.eup %2426 }
 0x7d2   : > { %1484 = vrot.lane.b32.xlu0 %v2427_v34, %s2553_s20  ;;  %v2429_v35 = vpop.eup %2428 }
 0x7d3   : > { %v2431_v40 = vpop.eup %2430 }
 0x7d4   : > { %v2433_v41 = vpop.eup %2432  ;;  %v1472_v42 = vadd.f32 1.0, %v2431_v40 }
 0x7d5   : > { %v2435_v43 = vpop.eup %2434  ;;  %v1696_v44 = vadd.f32 1.0, %v2433_v41 }
 0x7d6   : > { %1486 = vrot.lane.b32.xlu0 %v2429_v35, %s2553_s20  ;;  %v1473_v45 = vadd.f32 1.0, %v2435_v43  ;;  %2438 = vrcp.f32 %v1472_v42  ;;  %v2437_v46 = vpop.eup %2436 }
 0x7d7   : > { %2440 = vrcp.f32 %v1696_v44  ;;  %v1697_v47 = vadd.f32 1.0, %v2437_v46 }
 0x7d8   : > { %2442 = vrcp.f32 %v1473_v45 }
 0x7d9   : > { %2444 = vrcp.f32 %v1697_v47 }
 0x7e0   : > { %v2439_v14 = vpop.eup %2438 }
 0x7e1   : > { %v2441_v51 = vpop.eup %2440  ;;  %v1480_v58 = vmul.f32 %v2536_v10, %v2439_v14 }
 0x7e2   : > { %v2443_v3 = vpop.eup %2442  ;;  %v1714_v53 = vmul.f32 %v2441_v51, %v1709_v48  ;;  %v1704_v63 = vmul.f32 %v2520_v8, %v2441_v51 }
 0x7e3   : > { %v2445_v56 = vpop.eup %2444  ;;  %v1481_v60 = vmul.f32 %v2532_v9, %v2443_v3 }
 0x7e4   : > { %v1715_v57 = vmul.f32 %v2445_v56, %v1711_v55  ;;  %v1705_v4 = vmul.f32 %v2516_v7, %v2445_v56 }
 0x844   : > { %v1485_v49 = vpop.permute.xlu0 %1484 }
 0x845   : > { %v1490_v50 = vmul.f32 %v2439_v14, %v1485_v49 }
 0x847   : > { %1494 = vrot.lane.b32.xlu0 %v1490_v50, %s2554_s23 }
 0x848   : > { %v1487_v52 = vpop.permute.xlu0 %1486 }
 0x849   : > { %v1491_v54 = vmul.f32 %v2443_v3, %v1487_v52 }
 0x84b   : > { %1496 = vrot.lane.b32.xlu1 %v1491_v54, %s2554_s23  ;;  %1718 = vrot.lane.b32.xlu0 %v1714_v53, %s2554_s23 }
 0x84f   : > { %1720 = vrot.lane.b32.xlu1 %v1715_v57, %s2554_s23 }
 0x8b9   : > { %v1495_v59 = vpop.permute.xlu0 %1494 }
 0x8ba   : > { %v1500_v10 = vadd.f32 %v1495_v59, %v1480_v58  }
 0x8bc   : > { %2446 = vtanh.f32 %v1500_v10 }
 0x8bd   : > { %v1497_v11 = vpop.permute.xlu1 %1496  ;;  %v1719_v12 = vpop.permute.xlu0 %1718 }
 0x8be   : > { %v1501_v9 = vadd.f32 %v1497_v11, %v1481_v60   ;;  %v1724_v8 = vadd.f32 %v1719_v12, %v1704_v63  }
 0x8c0   : > { %2448 = vtanh.f32 %v1501_v9 }
 0x8c1   : > { %2450 = vtanh.f32 %v1724_v8  ;;  %v1721_v13 = vpop.permute.xlu1 %1720 }
 0x8c2   : > { %v1725_v7 = vadd.f32 %v1721_v13, %v1705_v4  }
 0x8c4   : > { %2452 = vtanh.f32 %v1725_v7 }
 0x8c6   : > { %v2447_v15 = vpop.eup %2446 }
 0x8c7   : > { %1506 = vrot.lane.b32.xlu0 %v2447_v15, %s2553_s20 }
 0x8ca   : > { %v2449_v16 = vpop.eup %2448 }
 0x8cb   : > { %v2451_v18 = vpop.eup %2450  ;;  %1508 = vrot.lane.b32.xlu1 %v2449_v16, %s2553_s20 }
 0x8cc   : > { %1730 = vrot.lane.b32.xlu0 %v2451_v18, %s2553_s20 }
 0x8ce   : > { %v2453_v19 = vpop.eup %2452 }
 0x8cf   : > { %1732 = vrot.lane.b32.xlu1 %v2453_v19, %s2553_s20 }
 0x939   : > { %v1507_v20 = vpop.permute.xlu0 %1506 }
 0x93a   : > { %v1512_v21 = vmul.f32 %v2439_v14, %v1507_v20 }
 0x93c   : > { %1740 = vrot.lane.b32.xlu0 %v1512_v21, %s2554_s23 }
 0x93d   : > { %v1509_v22 = vpop.permute.xlu1 %1508 }
 0x93e   : > { %v1513_v23 = vmul.f32 %v2443_v3, %v1509_v22  ;;  %v1731_v24 = vpop.permute.xlu0 %1730 }
 0x93f   : > { %v1736_v5 = vmul.f32 %v2441_v51, %v1731_v24 }
 0x940   : > { %1742 = vrot.lane.b32.xlu1 %v1513_v23, %s2554_s23 }
 0x941   : > { %1748 = vrot.lane.b32.xlu0 %v1736_v5, %s2554_s23  ;;  %v1733_v25 = vpop.permute.xlu1 %1732 }
 0x942   : > { %v1737_v26 = vmul.f32 %v2445_v56, %v1733_v25 }
 0x944   : > { %1750 = vrot.lane.b32.xlu1 %v1737_v26, %s2554_s23 }
 0x9ae   : > { %v1741_v27 = vpop.permute.xlu0 %1740  }
 0x9af   : > { %v3070_v3 = vmov %v1741_v27  ;;  %1755 = vst.msk [vmem:[%s3065_s9] sm:$0xff] (%p44_p0), %vm67_vm1, %v1741_v27 }
 0x9b1   :  { %46 = sbr.rel (!%p44_p0) target bundleno = 5 (0x5), region = 96 }
 0x9b2   : > { %v1743_v28 = vpop.permute.xlu1 %1742  }
 0x9b3   : > { %v1749_v29 = vpop.permute.xlu0 %1748   ;;  %v3069_v4 = vmov %v1743_v28  ;;  %1756 = vst.msk [vmem:[%s3065_s9 + $0x8] sm:$0xff] (%p44_p0), %vm67_vm1, %v1743_v28 }
 0x9b4   : > { %v3068_v5 = vmov %v1749_v29  ;;  %1757 = vst.msk [vmem:[#allocation2] sm:$0xff] (%p44_p0), %vm67_vm1, %v1749_v29 }
 0x9b6   : > { %v1751_v62 = vpop.permute.xlu1 %1750  }
 0x9b7   : > { %v3067_v6 = vmov %v1751_v62  ;;  %1758 = vst.msk [vmem:[#allocation2 + $0x8] sm:$0xff] (%p44_p0), %vm67_vm1, %v1751_v62 }
 0x9b8   :  { %2465 = shalt.err (!%p2462_p5)
}
 0x9b9   :  { %s2466_s6 = scalar_lea.hbm %s3066_s10, 256 }
 0x9ba   :  { %p2467_p6 = scmp.ne.s32.totalorder %s3066_s10, %s2466_s6  ;;  %p2470_p7 = scmp.lt.u32.totalorder %s2466_s6, %s3066_s10 }
 0x9bc   :  { %p2472_p8 = pnand %p2470_p7, %p2467_p6 }
 0x9be   :  { %2475 = shalt.err (!%p2472_p8)
}
 0x9bf   :  { %s2556_s28 = smov 128   ;;  %s2557_s29 = smov 8  }
 0x9c0   :  { %1772 = dma.vmem_to_hbm [thread:$0]  %s1767_s26, 256, %s3066_s10, [#allocation3], %s2556_s28, %s2556_s28, %s2557_s29  }
 0x9c1   :  { %2512 = dma.done.wait [#allocation3], 256  }
 0x9c2   :  { %2513 = vsyncadd [#allocation3], 4294967040 }
 0x9c3   :  { %1778 = vsyncpa [#allocation3], 1 }

</bundles_post_ra>
